<compile_context>
chip_gen: v6e
topology: v6e:2x2x1
jax: 0.10.0
libtpu: 0.0.40
codegen_flags: <defaults>
</compile_context>

<pallas_src>
import jax
import jax.numpy as jnp
from jax.experimental import pallas as pl
from jax.experimental.pallas import tpu as pltpu

LANE = 128
SUBLANE = 8


def _round_up(x, m):
    return (x + m - 1) // m * m


def actor_mlp_tanh_kernel(x_ref, w1_ref, b1_ref, w2_ref, b2_ref,
                          w3_ref, b3_ref, o_ref):
    bf16 = jnp.bfloat16
    # layer 1: Linear + ReLU   (bf16 operands, f32 accumulation on the MXU)
    x = x_ref[...].astype(bf16)
    h = jnp.dot(x, w1_ref[...], preferred_element_type=jnp.float32) + b1_ref[...]
    h = jnp.maximum(h, 0.0).astype(bf16)
    # layer 2: Linear + ReLU
    h = jnp.dot(h, w2_ref[...], preferred_element_type=jnp.float32) + b2_ref[...]
    h = jnp.maximum(h, 0.0).astype(bf16)
    # layer 3: Linear, then the ActorBase .tanh()  (tanh -> EUP slot, ~free)
    y = jnp.dot(h, w3_ref[...], preferred_element_type=jnp.float32) + b3_ref[...]
    act = o_ref.shape[1]                       # narrow (unpadded) output width
    o_ref[...] = jnp.tanh(y[:, :act]).astype(o_ref.dtype)


def _choose_batch_tile(batch, state_dim, mid_pad, act_pad, action_dim,
                       tb_max=4096, budget_bytes=12 << 20):
    """Largest batch tile <= tb_max whose working set fits a conservative
    ~12 MiB VMEM budget (safe on v5e's 16 MiB default scoped VMEM; plenty of
    slack on v6e / v7x)."""
    def tile_bytes(tb):
        # double-buffered f32 input / narrow f32 output tiles
        io = 2 * tb * (state_dim * 4 + action_dim * 4)
        # (double-buffered) resident bf16 weights + f32 biases
        w = 2 * ((state_dim * mid_pad + mid_pad * mid_pad + mid_pad * act_pad) * 2
                 + (2 * mid_pad + act_pad) * 4)
        # live f32 + bf16 hidden activations and f32 pre-tanh tile
        inter = tb * mid_pad * (4 + 2) + tb * act_pad * 4
        return io + w + inter

    tb = min(tb_max, _round_up(batch, SUBLANE))
    # keep >= 2 grid steps so the "parallel" axis can split across v7x's 2 TCs
    if batch >= 2 * SUBLANE:
        tb = min(tb, _round_up(pl.cdiv(batch, 2), SUBLANE))
    while tb > SUBLANE and tile_bytes(tb) > budget_bytes:
        tb = _round_up(tb // 2, SUBLANE)
    return max(tb, SUBLANE)


def prepare_params(params):
    """One-time: zero-pad weights/biases to lane-dense widths and cast the
    matmul operands to bf16.  Zero padding is exact (ReLU(0)=0 and zero
    K-rows contribute nothing)."""
    w1, b1, w2, b2, w3, b3 = params
    state_dim, mid_dim = w1.shape
    action_dim = w3.shape[1]
    mid_pad = _round_up(mid_dim, LANE)
    act_pad = _round_up(action_dim, LANE)
    f32, bf16 = jnp.float32, jnp.bfloat16

    w1p = jnp.zeros((state_dim, mid_pad), f32).at[:, :mid_dim].set(w1.astype(f32)).astype(bf16)
    b1p = jnp.zeros((1, mid_pad), f32).at[:, :mid_dim].set(b1.astype(f32).reshape(1, -1))
    w2p = jnp.zeros((mid_pad, mid_pad), f32).at[:mid_dim, :mid_dim].set(w2.astype(f32)).astype(bf16)
    b2p = jnp.zeros((1, mid_pad), f32).at[:, :mid_dim].set(b2.astype(f32).reshape(1, -1))
    w3p = jnp.zeros((mid_pad, act_pad), f32).at[:mid_dim, :action_dim].set(w3.astype(f32)).astype(bf16)
    b3p = jnp.zeros((1, act_pad), f32).at[:, :action_dim].set(b3.astype(f32).reshape(1, -1))
    return (w1p, b1p, w2p, b2p, w3p, b3p), action_dim


def actor_forward(state, prepped):
    """state: (B, state_dim) float32 -> (B, action_dim) float32 in (-1, 1)."""
    (w1p, b1p, w2p, b2p, w3p, b3p), action_dim = prepped
    batch, state_dim = state.shape
    mid_pad = w1p.shape[1]
    act_pad = w3p.shape[1]

    tb = _choose_batch_tile(batch, state_dim, mid_pad, act_pad, action_dim)
    grid = (pl.cdiv(batch, tb),)   # no jnp.pad of the batch; ragged edge is masked

    return pl.pallas_call(
        actor_mlp_tanh_kernel,
        out_shape=jax.ShapeDtypeStruct((batch, action_dim), jnp.float32),
        grid=grid,
        in_specs=[
            # batch-tiled activations (f32 in HBM, cast to bf16 in-kernel)
            pl.BlockSpec((tb, state_dim), lambda i: (i, 0)),
            # resident bf16 weights / f32 biases (constant index_map)
            pl.BlockSpec((state_dim, mid_pad), lambda i: (0, 0)),
            pl.BlockSpec((1, mid_pad), lambda i: (0, 0)),
            pl.BlockSpec((mid_pad, mid_pad), lambda i: (0, 0)),
            pl.BlockSpec((1, mid_pad), lambda i: (0, 0)),
            pl.BlockSpec((mid_pad, act_pad), lambda i: (0, 0)),
            pl.BlockSpec((1, act_pad), lambda i: (0, 0)),
        ],
        # narrow output block: last dim equals the full array dim (legal), so
        # HBM writeback is batch*action_dim*4 bytes, not a padded 128-lane slab
        out_specs=pl.BlockSpec((tb, action_dim), lambda i: (i, 0)),
        compiler_params=pltpu.CompilerParams(
            dimension_semantics=("parallel",),
        ),
    )(state, w1p, b1p, w2p, b2p, w3p, b3p)


def init_params(key, state_dim, mid_dim, action_dim):
    """Deterministic synthetic init (matches nn.Linear shapes, transposed)."""
    ks = jax.random.split(key, 6)

    def lin(kw, kb, fan_in, fan_out):
        bound = 1.0 / jnp.sqrt(jnp.float32(fan_in))
        w = jax.random.uniform(kw, (fan_in, fan_out), jnp.float32, -bound, bound)
        b = jax.random.uniform(kb, (1, fan_out), jnp.float32, -bound, bound)
        return w, b

    w1, b1 = lin(ks[0], ks[1], state_dim, mid_dim)
    w2, b2 = lin(ks[2], ks[3], mid_dim, mid_dim)
    w3, b3 = lin(ks[4], ks[5], mid_dim, action_dim)
    return (w1, b1, w2, b2, w3, b3)


def actor_forward_ref(state, params):
    """Pure-JAX f32 reference (same math as the PyTorch module)."""
    w1, b1, w2, b2, w3, b3 = params
    h = jnp.maximum(state @ w1 + b1, 0.0)
    h = jnp.maximum(h @ w2 + b2, 0.0)
    return jnp.tanh(h @ w3 + b3)


if __name__ == "__main__":
    key = jax.random.PRNGKey(0)
    k_state, k_params = jax.random.split(key)

    batch, state_dim, mid_dim, action_dim = 8, 32, 64, 4

    state = jax.random.normal(k_state, (batch, state_dim), jnp.float32)
    params = init_params(k_params, state_dim, mid_dim, action_dim)

    # one-time weight prep (padding + bf16 cast), reused across forward calls
    prepped = prepare_params(params)

    out = actor_forward(state, prepped)
    out = jax.block_until_ready(out)

    # sanity: shape, tanh range, and agreement with the pure-JAX f32 reference
    assert out.shape == (batch, action_dim)
    assert bool(jnp.all(jnp.abs(out) <= 1.0))
    ref = actor_forward_ref(state, params)
    # bf16 matmul operands (f32 accumulation) -> slightly looser tolerance
    assert bool(jnp.max(jnp.abs(out - ref)) < 2e-2)

    # TODO(synk): ActorBase.net is abstract (None) in the source; this kernel
    # concretizes it as the file's canonical 3-layer MLP before the .tanh().
    print("KERNEL_OK")
</pallas_src>

<mosaic_0001>
module attributes {stable_mosaic.version = 11 : i64} {
  func.func @actor_mlp_tanh_kernel(%arg0: i32, %arg1: memref<8x32xf32, #tpu.memory_space<vmem>>, %arg2: memref<32x128xbf16, #tpu.memory_space<vmem>>, %arg3: memref<1x128xf32, #tpu.memory_space<vmem>>, %arg4: memref<128x128xbf16, #tpu.memory_space<vmem>>, %arg5: memref<1x128xf32, #tpu.memory_space<vmem>>, %arg6: memref<128x128xbf16, #tpu.memory_space<vmem>>, %arg7: memref<1x128xf32, #tpu.memory_space<vmem>>, %arg8: memref<8x4xf32, #tpu.memory_space<vmem>>) attributes {dimension_semantics = [#tpu.dimension_semantics<parallel>], iteration_bounds = array<i64: 1>, scalar_prefetch = 0 : i64, scratch_operands = 0 : i64, tpu.core_type = #tpu.core_type<tc>, window_params = [{transform_indices = @transform_0, window_bounds = array<i64: 8, 32>}, {pipeline_mode = #tpu.pipeline_mode<synchronous>, transform_indices = @transform_1, window_bounds = array<i64: 32, 128>}, {pipeline_mode = #tpu.pipeline_mode<synchronous>, transform_indices = @transform_2, window_bounds = array<i64: 1, 128>}, {pipeline_mode = #tpu.pipeline_mode<synchronous>, transform_indices = @transform_3, window_bounds = array<i64: 128, 128>}, {pipeline_mode = #tpu.pipeline_mode<synchronous>, transform_indices = @transform_4, window_bounds = array<i64: 1, 128>}, {pipeline_mode = #tpu.pipeline_mode<synchronous>, transform_indices = @transform_5, window_bounds = array<i64: 128, 128>}, {pipeline_mode = #tpu.pipeline_mode<synchronous>, transform_indices = @transform_6, window_bounds = array<i64: 1, 128>}, {transform_indices = @transform_7, window_bounds = array<i64: 8, 4>}]} {
    %c0 = arith.constant 0 : index
    %c0_0 = arith.constant 0 : index
    %0 = vector.load %arg1[%c0, %c0_0] : memref<8x32xf32, #tpu.memory_space<vmem>>, vector<8x32xf32>
    %1 = arith.truncf %0 : vector<8x32xf32> to vector<8x32xbf16>
    %c0_1 = arith.constant 0 : index
    %c0_2 = arith.constant 0 : index
    %2 = vector.load %arg2[%c0_1, %c0_2] : memref<32x128xbf16, #tpu.memory_space<vmem>>, vector<32x128xbf16>
    %cst = arith.constant dense<0.000000e+00> : vector<8x128xf32>
    %3 = tpu.matmul %1, %2, %cst {dimension_numbers = #tpu.dot_dimension_numbers<[1], [0], [0], [1], [0, 0, 1, 1], [], []>} : vector<8x32xbf16>, vector<32x128xbf16>, vector<8x128xf32> -> vector<8x128xf32>
    %c0_3 = arith.constant 0 : index
    %c0_4 = arith.constant 0 : index
    %4 = vector.load %arg3[%c0_3, %c0_4] : memref<1x128xf32, #tpu.memory_space<vmem>>, vector<1x128xf32>
    %5 = vector.broadcast %4 : vector<1x128xf32> to vector<8x128xf32>
    %6 = arith.addf %3, %5 : vector<8x128xf32>
    %cst_5 = arith.constant 0.000000e+00 : f32
    %7 = vector.broadcast %cst_5 : f32 to vector<8x128xf32>
    %8 = arith.maximumf %6, %7 : vector<8x128xf32>
    %9 = arith.truncf %8 : vector<8x128xf32> to vector<8x128xbf16>
    %c0_6 = arith.constant 0 : index
    %c0_7 = arith.constant 0 : index
    %10 = vector.load %arg4[%c0_6, %c0_7] : memref<128x128xbf16, #tpu.memory_space<vmem>>, vector<128x128xbf16>
    %cst_8 = arith.constant dense<0.000000e+00> : vector<8x128xf32>
    %11 = tpu.matmul %9, %10, %cst_8 {dimension_numbers = #tpu.dot_dimension_numbers<[1], [0], [0], [1], [0, 0, 1, 1], [], []>} : vector<8x128xbf16>, vector<128x128xbf16>, vector<8x128xf32> -> vector<8x128xf32>
    %c0_9 = arith.constant 0 : index
    %c0_10 = arith.constant 0 : index
    %12 = vector.load %arg5[%c0_9, %c0_10] : memref<1x128xf32, #tpu.memory_space<vmem>>, vector<1x128xf32>
    %13 = vector.broadcast %12 : vector<1x128xf32> to vector<8x128xf32>
    %14 = arith.addf %11, %13 : vector<8x128xf32>
    %cst_11 = arith.constant 0.000000e+00 : f32
    %15 = vector.broadcast %cst_11 : f32 to vector<8x128xf32>
    %16 = arith.maximumf %14, %15 : vector<8x128xf32>
    %17 = arith.truncf %16 : vector<8x128xf32> to vector<8x128xbf16>
    %c0_12 = arith.constant 0 : index
    %c0_13 = arith.constant 0 : index
    %18 = vector.load %arg6[%c0_12, %c0_13] : memref<128x128xbf16, #tpu.memory_space<vmem>>, vector<128x128xbf16>
    %cst_14 = arith.constant dense<0.000000e+00> : vector<8x128xf32>
    %19 = tpu.matmul %17, %18, %cst_14 {dimension_numbers = #tpu.dot_dimension_numbers<[1], [0], [0], [1], [0, 0, 1, 1], [], []>} : vector<8x128xbf16>, vector<128x128xbf16>, vector<8x128xf32> -> vector<8x128xf32>
    %c0_15 = arith.constant 0 : index
    %c0_16 = arith.constant 0 : index
    %20 = vector.load %arg7[%c0_15, %c0_16] : memref<1x128xf32, #tpu.memory_space<vmem>>, vector<1x128xf32>
    %21 = vector.broadcast %20 : vector<1x128xf32> to vector<8x128xf32>
    %22 = arith.addf %19, %21 : vector<8x128xf32>
    %23 = vector.extract_strided_slice %22 {offsets = [0, 0], sizes = [8, 4], strides = [1, 1]} : vector<8x128xf32> to vector<8x4xf32>
    %24 = math.tanh %23 : vector<8x4xf32>
    %c0_17 = arith.constant 0 : index
    %c0_18 = arith.constant 0 : index
    %25 = vector.load %arg8[%c0_17, %c0_18] : memref<8x4xf32, #tpu.memory_space<vmem>>, vector<8x4xf32>
    tpu.vector_store %arg8[%c0_17, %c0_18], %24 {strides = array<i32>} : memref<8x4xf32, #tpu.memory_space<vmem>>, vector<8x4xf32>,
    return
  }
  func.func @transform_0(%arg0: i32) -> (i32, i32) {
    %c0_i32 = arith.constant 0 : i32
    %c0_i32_0 = arith.constant 0 : i32
    return %arg0, %c0_i32 : i32, i32
  }
  func.func @transform_1(%arg0: i32) -> (i32, i32) {
    %c0_i32 = arith.constant 0 : i32
    %c0_i32_0 = arith.constant 0 : i32
    %c0_i32_1 = arith.constant 0 : i32
    return %c0_i32, %c0_i32_0 : i32, i32
  }
  func.func @transform_2(%arg0: i32) -> (i32, i32) {
    %c0_i32 = arith.constant 0 : i32
    %c0_i32_0 = arith.constant 0 : i32
    %c0_i32_1 = arith.constant 0 : i32
    return %c0_i32, %c0_i32_0 : i32, i32
  }
  func.func @transform_3(%arg0: i32) -> (i32, i32) {
    %c0_i32 = arith.constant 0 : i32
    %c0_i32_0 = arith.constant 0 : i32
    %c0_i32_1 = arith.constant 0 : i32
    return %c0_i32, %c0_i32_0 : i32, i32
  }
  func.func @transform_4(%arg0: i32) -> (i32, i32) {
    %c0_i32 = arith.constant 0 : i32
    %c0_i32_0 = arith.constant 0 : i32
    %c0_i32_1 = arith.constant 0 : i32
    return %c0_i32, %c0_i32_0 : i32, i32
  }
  func.func @transform_5(%arg0: i32) -> (i32, i32) {
    %c0_i32 = arith.constant 0 : i32
    %c0_i32_0 = arith.constant 0 : i32
    %c0_i32_1 = arith.constant 0 : i32
    return %c0_i32, %c0_i32_0 : i32, i32
  }
  func.func @transform_6(%arg0: i32) -> (i32, i32) {
    %c0_i32 = arith.constant 0 : i32
    %c0_i32_0 = arith.constant 0 : i32
    %c0_i32_1 = arith.constant 0 : i32
    return %c0_i32, %c0_i32_0 : i32, i32
  }
  func.func @transform_7(%arg0: i32) -> (i32, i32) {
    %c0_i32 = arith.constant 0 : i32
    %c0_i32_0 = arith.constant 0 : i32
    return %arg0, %c0_i32 : i32, i32
  }
}

</mosaic_0001>

<bundles_post_ra>
// kernel: tpu_custom_call.1
= control target key start
LH: loop header
LB: loop body
LE: loop exit
PB: predicated region body
PF: predicated region fallthrough
CT: control target
= control target key end

     0   :  { %12 = vsyncpa [#allocation3], 0  ;;  %s695_s0 = inlined_call_operand.hbm [shape: f32[8,32], index: 0, kind: input, shape index: {}]   ;;  %s696_s1 = inlined_call_operand.hbm [shape: bf16[32,128], index: 1, kind: input, shape index: {}]   ;;  %s697_s2 = inlined_call_operand.vmem [shape: f32[1,128], index: 2, kind: input, shape index: {}]   ;;  %s698_s3 = inlined_call_operand.hbm [shape: bf16[128,128], index: 3, kind: input, shape index: {}]   ;;  %s699_s4 = inlined_call_operand.vmem [shape: f32[1,128], index: 4, kind: input, shape index: {}]   ;;  %s700_s5 = inlined_call_operand.hbm [shape: bf16[128,128], index: 5, kind: input, shape index: {}]   ;;  %s701_s6 = inlined_call_operand.vmem [shape: f32[1,128], index: 6, kind: input, shape index: {}]   ;;  %s702_s7 = inlined_call_operand.vmem [shape: f32[8,4], index: 7, kind: output, shape index: {}]  }
   0x1   :  { %13 = vsyncpa [#allocation5], 0 }
   0x2   :  { %14 = vsyncpa [#allocation8], 0  ;;  %s590_s24 = smov [#allocation4]  }
   0x3   :  { %s30_s25 = sshll.u32 %s590_s24, 4  ;;  %s31_s25 = int_to_ptr.vmem [resolvable:$true] %s30_s25 }
   0x4   :  { %s512_s26 = scalar_lea.vmem %s31_s25, 256  ;;  %p517_p1 = scmp.lt.s32.totalorder %s31_s25, %s31_s25 }
   0x5   :  { %p513_p0 = scmp.ne.s32.totalorder %s31_s25, %s512_s26  ;;  %p518_p2 = scmp.lt.s32.totalorder %s512_s26, %s512_s26 }
   0x7   :  { %p519_p3 = por %p518_p2, %p517_p1 }
   0x9   :  { %p520_p4 = pnand %p519_p3, %p513_p0 }
   0xb   :  { %523 = shalt.err (!%p520_p4)
}
   0xc   :  { %s591_s27 = smov 64   ;;  %s592_s28 = smov 4  }
   0xd   :  { %36 = dma.hbm_to_vmem [thread:$0]  %s696_s1, 256, %s31_s25, [#allocation5], %s591_s27, %s591_s27, %s592_s28  }
   0xe   :  { %s593_s8 = smov [#allocation2]   ;;  %s594_s10 = smov [#allocation6]  }
   0xf   :  { %s21_s9 = sshll.u32 %s593_s8, 4  ;;  %s44_s11 = sshll.u32 %s594_s10, 4  ;;  %s22_s9 = int_to_ptr.vmem [resolvable:$true] %s21_s9  ;;  %s45_s11 = int_to_ptr.vmem [resolvable:$true] %s44_s11 }
  0x10   :  { %s532_s12 = scalar_lea.vmem %s22_s9, 128  ;;  %p537_p6 = scmp.lt.s32.totalorder %s22_s9, %s22_s9 }
  0x11   :  { %p533_p5 = scmp.ne.s32.totalorder %s22_s9, %s532_s12  ;;  %p538_p7 = scmp.lt.s32.totalorder %s532_s12, %s532_s12 }
  0x13   :  { %p539_p8 = por %p538_p7, %p537_p6 }
  0x15   :  { %p540_p9 = pnand %p539_p8, %p533_p5 }
  0x17   :  { %543 = shalt.err (!%p540_p9)
}
  0x18   :  { %24 = dma.hbm_to_vmem [thread:$0]  %s695_s0, 128, %s22_s9, [#allocation3]  }
  0x19   :  { %s552_s15 = scalar_lea.vmem %s45_s11, 1024  ;;  %p557_p11 = scmp.lt.s32.totalorder %s45_s11, %s45_s11 }
  0x1a   :  { %p553_p10 = scmp.ne.s32.totalorder %s45_s11, %s552_s15  ;;  %p558_p12 = scmp.lt.s32.totalorder %s552_s15, %s552_s15 }
  0x1c   :  { %p559_p13 = por %p558_p12, %p557_p11 }
  0x1e   :  { %p560_p0 = pnand %p559_p13, %p553_p10 }
  0x20   :  { %563 = shalt.err (!%p560_p0)
}
  0x21   :  { %50 = dma.hbm_to_vmem [thread:$0]  %s698_s3, 1024, %s45_s11, [#allocation5], %s591_s27, %s591_s27, %s592_s28  }
  0x22   :  { %s595_s17 = smov [#allocation7]  }
  0x23   :  { %s58_s18 = sshll.u32 %s595_s17, 4  ;;  %s59_s18 = int_to_ptr.vmem [resolvable:$true] %s58_s18 }
  0x24   :  { %s572_s19 = scalar_lea.vmem %s59_s18, 1024  ;;  %p577_p2 = scmp.lt.s32.totalorder %s59_s18, %s59_s18 }
  0x25   :  { %p573_p1 = scmp.ne.s32.totalorder %s59_s18, %s572_s19  ;;  %p578_p3 = scmp.lt.s32.totalorder %s572_s19, %s572_s19 }
  0x27   :  { %p579_p4 = por %p578_p3, %p577_p2 }
  0x29   :  { %p580_p5 = pnand %p579_p4, %p573_p1 }
  0x2b   :  { %583 = shalt.err (!%p580_p5)
}
  0x2c   :  { %64 = dma.hbm_to_vmem [thread:$0]  %s700_s5, 1024, %s59_s18, [#allocation8], %s591_s27, %s591_s27, %s592_s28  }
  0x2d   :  { %584 = dma.done.wait [#allocation3], 128  }
  0x2e   :  { %585 = vsyncadd [#allocation3], 4294967168 }
  0x2f   :  { %586 = dma.done.wait [#allocation5], 1280  }
  0x30   :  { %587 = vsyncadd [#allocation5], 4294966016 }
  0x31   :  { %588 = dma.done.wait [#allocation8], 1024  }
  0x32   :  { %589 = vsyncadd [#allocation8], 4294966272  ;;  %v596_v0 = vmov 0.0   ;;  %vm597_vm0 = vmmov 0   ;;  %v484_v1 = vld [vmem:[#allocation4 + $0x8] sm:$0xff]   ;;  %v485_v2 = vld [vmem:[#allocation4] sm:$0xff]  }
  0x33   :  { %428 = vmatprep.subr.bf16.mxu0 %v596_v0  ;;  %432 = vmatprep.mubr.msk.bf16.mxu0 %vm597_vm0, %v596_v0  ;;  %v80_v3 = vld [vmem:[#allocation2] sm:$0xff]  ;;  %v486_v4 = vld [vmem:[#allocation6 + $0x38] sm:$0xff]   ;;  %v487_v6 = vld [vmem:[#allocation6 + $0x30] sm:$0xff]   ;;  %vm105_vm1 = vcmask 261120   ;;  %vm376_vm2 = vcmask 31744  }
  0x34   :  { %436 = vmatprep.subr.bf16.mxu1 %v596_v0  ;;  %452 = vmatprep.mubr.msk.bf16.mxu1 %vm597_vm0, %v596_v0  ;;  %v81_v5 = vpack.c.bf16 %v80_v3, %v80_v3  ;;  %v488_v7 = vld [vmem:[#allocation6 + $0x28] sm:$0xff]   ;;  %v489_v8 = vld [vmem:[#allocation6 + $0x20] sm:$0xff]   ;;  %v490_v9 = vld [vmem:[#allocation6 + $0x18] sm:$0xff]  }
  0x35   :  { %429 = vmatpush3.bf16.msra.mxu0 %v484_v1  ;;  %437 = vmatpush3.bf16.msra.mxu1 %v486_v4  ;;  %v491_v10 = vld [vmem:[#allocation6 + $0x10] sm:$0xff]   ;;  %v492_v11 = vld [vmem:[#allocation6 + $0x8] sm:$0xff]   ;;  %v493_v12 = vld [vmem:[#allocation6] sm:$0xff]  }
  0x36   :  { %430 = vmatprep.subr.bf16.mxu0 %v596_v0  ;;  %438 = vmatprep.subr.bf16.mxu1 %v596_v0  ;;  %v494_v13 = vld [vmem:[#allocation7 + $0x38] sm:$0xff]   ;;  %v495_v14 = vld [vmem:[#allocation7 + $0x30] sm:$0xff]   ;;  %v496_v15 = vld [vmem:[#allocation7 + $0x28] sm:$0xff]  }
  0x37   :  { %v497_v16 = vld [vmem:[#allocation7 + $0x20] sm:$0xff]   ;;  %v498_v17 = vld [vmem:[#allocation7 + $0x18] sm:$0xff]   ;;  %v499_v18 = vld [vmem:[#allocation7 + $0x10] sm:$0xff]  }
  0x38   :  { %v385_v19 = vld [vmem:[%s697_s2] ss:$0 sm:$0xff]  ;;  %v501_v28 = vld [vmem:[#allocation7] sm:$0xff]  }
  0x39   :  { %431 = vmatpush3.bf16.msra.mxu0 %v485_v2  ;;  %439 = vmatpush3.bf16.msra.mxu1 %v487_v6  ;;  %v500_v27 = vld [vmem:[#allocation7 + $0x8] sm:$0xff]  }
  0x3a   :  { %456 = vmatprep.subr.bf16.mxu0 %v596_v0  ;;  %440 = vmatprep.subr.bf16.mxu1 %v596_v0  ;;  %v389_v29 = vld [vmem:[%s699_s4] ss:$0 sm:$0xff] }
  0x3b   :  { %v398_v37 = vld [vmem:[%s701_s6] ss:$0 sm:$0xff] }
  0x3c   :  { %433 = vmatmul.mubr.msk.bf16.vlgmr.msra.gmra.mxu0 %vm105_vm1, %v81_v5 }
  0x3d   :  { %472 = vmatprep.mubr.msk.bf16.mxu0 %vm597_vm0, %v596_v0  ;;  %441 = vmatpush3.bf16.msra.mxu1 %v488_v7 }
  0x3e   :  { %442 = vmatprep.subr.bf16.mxu1 %v596_v0  ;;  %457 = vmatpush3.bf16.msra.mxu0 %v494_v13 }
  0x3f   :  { %458 = vmatprep.subr.bf16.mxu0 %v596_v0 }
  0x41   :  { %443 = vmatpush3.bf16.msra.mxu1 %v489_v8 }
  0x42   :  { %444 = vmatprep.subr.bf16.mxu1 %v596_v0  ;;  %459 = vmatpush3.bf16.msra.mxu0 %v495_v14 }
  0x43   :  { %460 = vmatprep.subr.bf16.mxu0 %v596_v0 }
  0x45   :  { %445 = vmatpush3.bf16.msra.mxu1 %v490_v9 }
  0x46   :  { %446 = vmatprep.subr.bf16.mxu1 %v596_v0  ;;  %461 = vmatpush3.bf16.msra.mxu0 %v496_v15 }
  0x47   :  { %462 = vmatprep.subr.bf16.mxu0 %v596_v0 }
  0x49   :  { %447 = vmatpush3.bf16.msra.mxu1 %v491_v10 }
  0x4a   :  { %448 = vmatprep.subr.bf16.mxu1 %v596_v0  ;;  %463 = vmatpush3.bf16.msra.mxu0 %v497_v16 }
  0x4b   :  { %464 = vmatprep.subr.bf16.mxu0 %v596_v0 }
  0x4d   :  { %449 = vmatpush3.bf16.msra.mxu1 %v492_v11 }
  0x4e   :  { %450 = vmatprep.subr.bf16.mxu1 %v596_v0  ;;  %465 = vmatpush3.bf16.msra.mxu0 %v498_v17 }
  0x4f   :  { %466 = vmatprep.subr.bf16.mxu0 %v596_v0 }
  0x51   :  { %451 = vmatpush3.bf16.msra.mxu1 %v493_v12 }
  0x52   :  { %467 = vmatpush3.bf16.msra.mxu0 %v499_v18 }
  0x53   :  { %468 = vmatprep.subr.bf16.mxu0 %v596_v0 }
  0x56   :  { %469 = vmatpush3.bf16.msra.mxu0 %v500_v27 }
  0x57   :  { %470 = vmatprep.subr.bf16.mxu0 %v596_v0 }
  0x5a   :  { %471 = vmatpush3.bf16.msra.mxu0 %v501_v28 }
  0xfc   :  { %v143_v20 = vpop.f32.mrf.mxu0 }
  0xfd   :  { %v144_v21 = vadd.f32 %v385_v19, %v143_v20 }
  0xfe   :  { %v434_v22 = vpop.f32.mrf.mxu0 }
  0xff   :  { %v149_v23 = vmax.f32 %v144_v21, 0.0 }
 0x100   :  { %v146_v24 = vpop.f32.mrf.mxu0 }
 0x101   :  { %v150_v25 = vpack.c.bf16 %v149_v23, %v149_v23 }
 0x102   :  { %v435_v26 = vpop.f32.mrf.mxu0 }
 0x103   :  { %453 = vmatmul.mubr.bf16.vlgmr.msra.gmra.mxu1 %v150_v25 }
 0x1c3   :  { %v256_v30 = vpop.f32.mrf.mxu1 }
 0x1c4   :  { %v257_v31 = vadd.f32 %v389_v29, %v256_v30 }
 0x1c5   :  { %v454_v32 = vpop.f32.mrf.mxu1 }
 0x1c6   :  { %v262_v33 = vmax.f32 %v257_v31, 0.0 }
 0x1c7   :  { %v259_v34 = vpop.f32.mrf.mxu1 }
 0x1c8   :  { %v263_v35 = vpack.c.bf16 %v262_v33, %v262_v33 }
 0x1c9   :  { %v455_v36 = vpop.f32.mrf.mxu1 }
 0x1ca   :  { %473 = vmatmul.mubr.bf16.vlgmr.msra.gmra.mxu0 %v263_v35 }
 0x28a   :  { %v369_v38 = vpop.f32.mrf.mxu0 }
 0x28b   :  { %v370_v39 = vadd.f32 %v398_v37, %v369_v38 }
 0x28c   :  { %v474_v40 = vpop.f32.mrf.mxu0 }
 0x28d   :  { %502 = vtanh.f32 %v370_v39 }
 0x28e   :  { %v372_v41 = vpop.f32.mrf.mxu0 }
 0x290   :  { %v475_v42 = vpop.f32.mrf.mxu0 }
 0x29a   :  { %v503_v43 = vpop.eup %502 }
 0x29b   :  { %377 = vst.msk [vmem:[%s702_s7] sm:$0xff] %vm376_vm2, %v503_v43 }
 0x29c   :  { %382 = vsyncpa [#allocation3], 1 }
 0x29d   :  { %383 = vsyncpa [#allocation5], 1 }
 0x29e   :  { %384 = vsyncpa [#allocation8], 1 }

</bundles_post_ra>
